<compile_context>
chip_gen: v7x
topology: tpu7x:2x2x1
jax: 0.10.0
libtpu: 0.0.40
codegen_flags: <defaults>
</compile_context>

<pallas_src>
from functools import partial

import jax
import jax.numpy as jnp
from jax.experimental import pallas as pl
from jax.experimental.pallas import tpu as pltpu

EPS = 1e-5       # torch.nn.GroupNorm default eps
LANES = 128


def _gn1_kernel(x_ref, g_ref, b_ref, o_ref, *, inv_n, fused_fn):
    # x_ref block: (Nb, rows, lanes). GroupNorm with one group == per-sample
    # stats over everything after the batch dim, i.e. reduce over axes (1, 2).
    #
    # One-pass moments in f32 (var = E[x^2] - mean^2, clamped >= 0).
    # TODO(synk): switch to a shifted two-pass variance if bit-level parity
    # with torch's computation is required for strongly non-centered data.
    xs = x_ref[...].astype(jnp.float32)
    s = jnp.sum(xs, axis=(1, 2), keepdims=True)             # (Nb, 1, 1)
    ss = jnp.sum(xs * xs, axis=(1, 2), keepdims=True)       # (Nb, 1, 1)
    mean = s * inv_n
    var = jnp.maximum(ss * inv_n - mean * mean, 0.0)        # biased, as torch
    inv = jax.lax.rsqrt(var + EPS)                          # (Nb, 1, 1)

    # gamma/beta arrive lane-dense ((rows, lanes), already f32), so the
    # normalize pass is a pure elementwise chain - no 1-lane broadcasts.
    g = g_ref[...][None]                                    # (1, rows, lanes)
    b = b_ref[...][None]

    # Re-read x (VMEM vld is cheap, 3 slots/cycle) so the f32 stats copy does
    # not have to stay live across the normalize pass (bf16 VMEM win).
    x = x_ref[...].astype(jnp.float32)
    y = (x - mean) * inv * g + b

    if fused_fn is not None:
        y = fused_fn(y)                                     # elementwise only

    o_ref[...] = y.astype(o_ref.dtype)


def _choose_batch_block(n, per_sample_bytes, target_bytes=2 << 20, min_steps=4):
    """Samples per block: largest divisor of n whose f32 block stays under
    target_bytes while leaving >= min_steps grid steps (DMA pipelining plus
    sharding the parallel batch axis across both v7x TensorCores)."""
    divisors = [d for d in range(1, n + 1) if n % d == 0]
    for want_steps in (min_steps, 2, 1):
        cands = [d for d in divisors
                 if d * per_sample_bytes <= target_bytes and n // d >= want_steps]
        if cands:
            return max(cands)
    # A single sample already exceeds the target: take one per grid step.
    # TODO(synk): samples larger than the VMEM budget would need a two-pass
    # (stats, then normalize) scheme with HW tiled on a second grid axis.
    return 1


def groupnorm1(x, gamma, beta, fused_fn=None):
    """GroupNorm(num_groups=1, num_channels=C) over NCHW input x."""
    N, C, H, W = x.shape
    HW = H * W

    if HW % LANES == 0:
        # Lane-dense layout (N, C*HW/128, 128); contiguous reshape -> no copy.
        rpc = HW // LANES
        rows, lanes = C * rpc, LANES
        xr = x.reshape(N, rows, lanes)
        g_rows = jnp.repeat(gamma.astype(jnp.float32), rpc)       # (rows,)
        b_rows = jnp.repeat(beta.astype(jnp.float32), rpc)
        g_t = jnp.broadcast_to(g_rows[:, None], (rows, lanes))
        b_t = jnp.broadcast_to(b_rows[:, None], (rows, lanes))
    else:
        # Ragged spatial size: keep full-extent (C, HW) tiles; Mosaic masks
        # the lane tail. No pad / slice HBM round-trips around the kernel.
        rows, lanes = C, HW
        xr = x.reshape(N, rows, lanes)
        g_t = jnp.broadcast_to(gamma.astype(jnp.float32)[:, None], (rows, lanes))
        b_t = jnp.broadcast_to(beta.astype(jnp.float32)[:, None], (rows, lanes))

    # Budget blocks by their f32 footprint (the kernel upcasts), ~2 MiB target:
    # measured tiling curves already hit ~85% of HBM roofline there, and small
    # blocks keep the grid long enough for pipelining on all chip generations.
    per_sample_f32_bytes = rows * lanes * 4
    nb = _choose_batch_block(N, per_sample_f32_bytes)
    grid = (N // nb,)

    kernel = partial(_gn1_kernel, inv_n=1.0 / float(C * HW), fused_fn=fused_fn)

    out = pl.pallas_call(
        kernel,
        out_shape=jax.ShapeDtypeStruct((N, rows, lanes), x.dtype),
        grid_spec=pltpu.PrefetchScalarGridSpec(
            num_scalar_prefetch=0,
            grid=grid,
            in_specs=[
                pl.BlockSpec((nb, rows, lanes), lambda n: (n, 0, 0)),
                # gamma/beta: constant index_map -> DMA'd once, reused per step.
                pl.BlockSpec((rows, lanes), lambda n: (0, 0)),
                pl.BlockSpec((rows, lanes), lambda n: (0, 0)),
            ],
            out_specs=pl.BlockSpec((nb, rows, lanes), lambda n: (n, 0, 0)),
        ),
        compiler_params=pltpu.CompilerParams(
            dimension_semantics=("parallel",),
            # ~2 MiB f32 blocks keep the working set far below this on
            # v5e/v6e/v7x (v7x has only 64 MiB physical VMEM).
            vmem_limit_bytes=48 * 1024 * 1024,
        ),
    )(xr, g_t, b_t)

    return out.reshape(N, C, H, W)


def pre_norm(x, gamma, beta, fn=lambda y: y, fused_elementwise_fn=None):
    """PreNorm.forward: fn(GroupNorm(1, dim)(x)).

    `fn` is the arbitrary wrapped submodule (attention, conv block, ...) and is
    applied as a plain JAX callable after the in-kernel normalization.  If the
    wrapped op is purely elementwise, pass it as `fused_elementwise_fn` to fuse
    it into the same pallas_call (saves one HBM round-trip).
    """
    # TODO(synk): non-elementwise `fn` submodules are not translated to Pallas
    # here; only the GroupNorm hot path (plus optional elementwise fusion) is.
    return fn(groupnorm1(x, gamma, beta, fused_fn=fused_elementwise_fn))


if __name__ == "__main__":
    key = jax.random.PRNGKey(0)
    kx, kg, kb = jax.random.split(key, 3)

    N, C, H, W = 2, 4, 16, 16
    x = jax.random.normal(kx, (N, C, H, W), dtype=jnp.float32)
    gamma = 1.0 + 0.1 * jax.random.normal(kg, (C,), dtype=jnp.float32)
    beta = 0.1 * jax.random.normal(kb, (C,), dtype=jnp.float32)

    out = pre_norm(x, gamma, beta, fn=lambda y: y)
    out = jax.block_until_ready(out)

    # Reference in plain JAX (GroupNorm with 1 group == per-sample layernorm
    # over C,H,W followed by per-channel affine).
    xf = x.reshape(N, -1)
    mean = xf.mean(axis=1, keepdims=True)
    var = ((xf - mean) ** 2).mean(axis=1, keepdims=True)
    ref = ((xf - mean) / jnp.sqrt(var + EPS)).reshape(N, C, H, W)
    ref = ref * gamma.reshape(1, C, 1, 1) + beta.reshape(1, C, 1, 1)

    assert jnp.allclose(out, ref, atol=2e-5, rtol=2e-5), "mismatch vs reference"
    print("KERNEL_OK")
</pallas_src>

<mosaic_0001>
module attributes {stable_mosaic.version = 11 : i64} {
  func.func @_gn1_kernel(%arg0: i32, %arg1: memref<1x8x128xf32, #tpu.memory_space<vmem>>, %arg2: memref<8x128xf32, #tpu.memory_space<vmem>>, %arg3: memref<8x128xf32, #tpu.memory_space<vmem>>, %arg4: memref<1x8x128xf32, #tpu.memory_space<vmem>>) attributes {dimension_semantics = [#tpu.dimension_semantics<parallel>], iteration_bounds = array<i64: 2>, scalar_prefetch = 0 : i64, scratch_operands = 0 : i64, tpu.core_type = #tpu.core_type<tc>, window_params = [{transform_indices = @transform_0, window_bounds = array<i64: 1, 8, 128>}, {pipeline_mode = #tpu.pipeline_mode<synchronous>, transform_indices = @transform_1, window_bounds = array<i64: 8, 128>}, {pipeline_mode = #tpu.pipeline_mode<synchronous>, transform_indices = @transform_2, window_bounds = array<i64: 8, 128>}, {transform_indices = @transform_3, window_bounds = array<i64: 1, 8, 128>}]} {
    %c0 = arith.constant 0 : index
    %c0_0 = arith.constant 0 : index
    %c0_1 = arith.constant 0 : index
    %0 = vector.load %arg1[%c0, %c0_0, %c0_1] : memref<1x8x128xf32, #tpu.memory_space<vmem>>, vector<1x8x128xf32>
    %cst = arith.constant dense<0.000000e+00> : vector<1xf32>
    %1 = vector.multi_reduction <add>, %0, %cst [1, 2] : vector<1x8x128xf32> to vector<1xf32>
    %2 = vector.shape_cast %1 : vector<1xf32> to vector<1x1x1xf32>
    %3 = arith.mulf %0, %0 : vector<1x8x128xf32>
    %cst_2 = arith.constant dense<0.000000e+00> : vector<1xf32>
    %4 = vector.multi_reduction <add>, %3, %cst_2 [1, 2] : vector<1x8x128xf32> to vector<1xf32>
    %5 = vector.shape_cast %4 : vector<1xf32> to vector<1x1x1xf32>
    %cst_3 = arith.constant 9.765625E-4 : f32
    %6 = vector.broadcast %cst_3 : f32 to vector<1x1x1xf32>
    %7 = arith.mulf %2, %6 : vector<1x1x1xf32>
    %cst_4 = arith.constant 9.765625E-4 : f32
    %8 = vector.broadcast %cst_4 : f32 to vector<1x1x1xf32>
    %9 = arith.mulf %5, %8 : vector<1x1x1xf32>
    %10 = arith.mulf %7, %7 : vector<1x1x1xf32>
    %11 = arith.subf %9, %10 : vector<1x1x1xf32>
    %cst_5 = arith.constant 0.000000e+00 : f32
    %12 = vector.broadcast %cst_5 : f32 to vector<1x1x1xf32>
    %13 = arith.maximumf %11, %12 : vector<1x1x1xf32>
    %cst_6 = arith.constant 9.99999974E-6 : f32
    %14 = vector.broadcast %cst_6 : f32 to vector<1x1x1xf32>
    %15 = arith.addf %13, %14 : vector<1x1x1xf32>
    %16 = math.rsqrt %15 : vector<1x1x1xf32>
    %c0_7 = arith.constant 0 : index
    %c0_8 = arith.constant 0 : index
    %17 = vector.load %arg2[%c0_7, %c0_8] : memref<8x128xf32, #tpu.memory_space<vmem>>, vector<8x128xf32>
    %18 = vector.shape_cast %17 : vector<8x128xf32> to vector<1x8x128xf32>
    %c0_9 = arith.constant 0 : index
    %c0_10 = arith.constant 0 : index
    %19 = vector.load %arg3[%c0_9, %c0_10] : memref<8x128xf32, #tpu.memory_space<vmem>>, vector<8x128xf32>
    %20 = vector.shape_cast %19 : vector<8x128xf32> to vector<1x8x128xf32>
    %c0_11 = arith.constant 0 : index
    %c0_12 = arith.constant 0 : index
    %c0_13 = arith.constant 0 : index
    %21 = vector.load %arg1[%c0_11, %c0_12, %c0_13] : memref<1x8x128xf32, #tpu.memory_space<vmem>>, vector<1x8x128xf32>
    %22 = vector.broadcast %7 : vector<1x1x1xf32> to vector<1x8x128xf32>
    %23 = arith.subf %21, %22 : vector<1x8x128xf32>
    %24 = vector.broadcast %16 : vector<1x1x1xf32> to vector<1x8x128xf32>
    %25 = arith.mulf %23, %24 : vector<1x8x128xf32>
    %26 = arith.mulf %25, %18 : vector<1x8x128xf32>
    %27 = arith.addf %26, %20 : vector<1x8x128xf32>
    %c0_14 = arith.constant 0 : index
    %c0_15 = arith.constant 0 : index
    %c0_16 = arith.constant 0 : index
    %28 = vector.load %arg4[%c0_14, %c0_15, %c0_16] : memref<1x8x128xf32, #tpu.memory_space<vmem>>, vector<1x8x128xf32>
    tpu.vector_store %arg4[%c0_14, %c0_15, %c0_16], %27 {strides = array<i32>} : memref<1x8x128xf32, #tpu.memory_space<vmem>>, vector<1x8x128xf32>,
    return
  }
  func.func @transform_0(%arg0: i32) -> (i32, i32, i32) {
    %c0_i32 = arith.constant 0 : i32
    %c0_i32_0 = arith.constant 0 : i32
    %c0_i32_1 = arith.constant 0 : i32
    return %arg0, %c0_i32, %c0_i32_0 : i32, i32, i32
  }
  func.func @transform_1(%arg0: i32) -> (i32, i32) {
    %c0_i32 = arith.constant 0 : i32
    %c0_i32_0 = arith.constant 0 : i32
    %c0_i32_1 = arith.constant 0 : i32
    return %c0_i32, %c0_i32_0 : i32, i32
  }
  func.func @transform_2(%arg0: i32) -> (i32, i32) {
    %c0_i32 = arith.constant 0 : i32
    %c0_i32_0 = arith.constant 0 : i32
    %c0_i32_1 = arith.constant 0 : i32
    return %c0_i32, %c0_i32_0 : i32, i32
  }
  func.func @transform_3(%arg0: i32) -> (i32, i32, i32) {
    %c0_i32 = arith.constant 0 : i32
    %c0_i32_0 = arith.constant 0 : i32
    %c0_i32_1 = arith.constant 0 : i32
    return %arg0, %c0_i32, %c0_i32_0 : i32, i32, i32
  }
}

</mosaic_0001>

<bundles_post_ra>
// kernel: tpu_custom_call.1
= control target key start
LH: loop header
LB: loop body
LE: loop exit
PB: predicated region body
PF: predicated region fallthrough
CT: control target
= control target key end

     0   :  { %8 = vsyncpa [#allocation3], 0  ;;  %s842_s0 = inlined_call_operand.hbm [shape: f32[2,8,128], index: 0, kind: input, shape index: {}]   ;;  %s843_s1 = inlined_call_operand.hbm [shape: f32[8,128], index: 1, kind: input, shape index: {}]   ;;  %s844_s2 = inlined_call_operand.hbm [shape: f32[8,128], index: 2, kind: input, shape index: {}]   ;;  %s845_s3 = inlined_call_operand.hbm [shape: f32[2,8,128], index: 3, kind: output, shape index: {}]  }
   0x1   :  { %10 = vsyncpa [#allocation3 + $0x1], 0 }
   0x2   :  { %11 = vsyncpa [#allocation6], 0 }
   0x3   :  { %12 = vsyncpa [#allocation4], 0 }
   0x4   :  { %14 = vsyncpa [#allocation4 + $0x1], 0  ;;  %s613_s12 = smov 0   ;;  %s615_s13 = smov 0  }
   0x5   :  { %s617_s14 = smov 0   ;;  %s619_s15 = smov 0  }
   0x6 LB: > { %s634_s16 = sadd.s32 4294967295, %s587_s15   ;;  %s346_s17 = sadd.s32 4294967294, %s587_s15   ;;  %s587_s15 = sphi %s619_s15, %s865_s15   ;;  %s583_s14 = sphi %s617_s14, %s864_s14   ;;  %s579_s13 = sphi %s615_s13, %s863_s13   ;;  %s575_s12 = sphi %s613_s12, %s862_s12  }
   0x7   : > { %p40_p0 = scmp.ne.s32.totalorder %s579_s13, %s575_s12  ;;  %p846_p1 = scmp.eq.s32.totalorder %s634_s16, 0 }
   0x8   : > { %p112_p3 = scmp.eq.s32.totalorder %s346_s17, 1  ;;  %p347_p5 = scmp.ge.s32.totalorder %s587_s15, 1 }
   0x9   : > { %p643_p4 = por %p846_p1, %p40_p0  ;;  %p119_p7 = scmp.lt.s32.totalorder %s587_s15, 3 }
   0xa   : > { %p648_p6 = por %p112_p3, %p40_p0  ;;  %s589_s21 = smov [#allocation5]  }
   0xb   : > { %s849_s18 = scalar_select %p643_p4, 1, 0 }
   0xc   : > { %s850_s19 = scalar_select %p648_p6, 1, 0 }
   0xd   : > { %p653_p8 = pnand %p347_p5, %p119_p7  ;;  %s132_s22 = sshll.u32 %s589_s21, 4  ;;  %s133_s22 = int_to_ptr.vmem [resolvable:$true] %s132_s22 }
   0xe   : > { %s590_s23 = smov [#allocation7]   ;;  %s669_s26 = sadd.s32 1, %s587_s15  }
   0xf   : > { %s851_s20 = scalar_select %p653_p8, 1, 0 }
  0x10   : > { %p374_p10 = pneg %p653_p8  ;;  %s143_s24 = sshll.u32 %s590_s23, 4  ;;  %s666_s24 = int_to_ptr.vmem [resolvable:$true] %s143_s24 }
  0x11   : > { %s24_s27 = ssub.s32 %s587_s15, %s669_s26  ;;  %s431_s30 = scalar_lea.hbm %s843_s1, 128 }
  0x12   : > { %p662_p11 = pnand %p374_p10, %p846_p1  ;;  %p432_p12 = scmp.ne.s32.totalorder %s843_s1, %s431_s30 }
  0x13   : > { %p438_p5 = scmp.lt.u32.totalorder %s431_s30, %s843_s1 }
  0x14   : > { %p433_p13 = pneg %p662_p11 }
  0x16   : > { %p434_p0 = pnand %p433_p13, %p432_p12 }
  0x18   : > { %p435_p3 = pneg %p434_p0 }
  0x1a   : > { %p440_p7 = pnand %p438_p5, %p435_p3 }
  0x1c   : > { %443 = shalt.err (!%p440_p7)
}
  0x1d   : > { %s444_s8 = scalar_lea.vmem %s133_s22, 128  ;;  %p452_p2 = scmp.lt.s32.totalorder %s133_s22, %s133_s22 }
  0x1e   : > { %p445_p10 = scmp.ne.s32.totalorder %s133_s22, %s444_s8  ;;  %p453_p6 = scmp.lt.s32.totalorder %s444_s8, %s444_s8 }
  0x20   : > { %p447_p9 = pnand %p445_p10, %p433_p13  ;;  %p454_p4 = por %p453_p6, %p452_p2 }
  0x22   : > { %p448_p1 = pneg %p447_p9 }
  0x24   : > { %p455_p8 = pnand %p454_p4, %p448_p1 }
  0x26   : > { %458 = shalt.err (!%p455_p8)
}
  0x27   : > { %377 = dma.hbm_to_vmem [thread:$0]  (!%p662_p11), %s843_s1, 128, %s133_s22, [#allocation6]  }
  0x28   : > { %s459_s21 = scalar_lea.hbm %s844_s2, 128 }
  0x29   : > { %p460_p9 = scmp.ne.s32.totalorder %s844_s2, %s459_s21  ;;  %p466_p4 = scmp.lt.u32.totalorder %s459_s21, %s844_s2 }
  0x2b   : > { %p462_p2 = pnand %p460_p9, %p433_p13 }
  0x2d   : > { %p463_p1 = pneg %p462_p2 }
  0x2f   : > { %p468_p6 = pnand %p466_p4, %p463_p1 }
  0x31   : > { %471 = shalt.err (!%p468_p6)
}
  0x32   : > { %s472_s22 = scalar_lea.vmem %s666_s24, 128  ;;  %p480_p3 = scmp.lt.s32.totalorder %s666_s24, %s666_s24 }
  0x33   : > { %p473_p8 = scmp.ne.s32.totalorder %s666_s24, %s472_s22  ;;  %p481_p5 = scmp.lt.s32.totalorder %s472_s22, %s472_s22 }
  0x35   : > { %p475_p12 = pnand %p473_p8, %p433_p13  ;;  %p482_p7 = por %p481_p5, %p480_p3 }
  0x37   : > { %p476_p0 = pneg %p475_p12 }
  0x39   : > { %p483_p10 = pnand %p482_p7, %p476_p0 }
  0x3b   : > { %486 = shalt.err (!%p483_p10)
}
  0x3c   : > { %380 = dma.hbm_to_vmem [thread:$0]  (!%p662_p11), %s844_s2, 128, %s666_s24, [#allocation6]  }
  0x3d   : > { %p25_p13 = scmp.eq.s32.totalorder %s24_s27, 0  ;;  %s27_s6 = sadd.s32 1, %s583_s14 }
  0x3e   : > { %p34_p9 = scmp.ne.s32.totalorder %s583_s14, %s579_s13  ;;  %p35_p2 = scmp.eq.s32.totalorder %s587_s15, 0 }
  0x3f   : > { %s728_s25 = scalar_select %p25_p13, %s583_s14, %s27_s6  }
  0x40   : > { %p36_p1 = por %p35_p2, %p34_p9  ;;  %p853_p4 = scmp.eq.s32.totalorder %s634_s16, 1 }
  0x41   : > { %p391_p8 = scmp.lt.s32.totalorder %s587_s15, 2  ;;  %s154_s8 = sand.u32 1, %s583_s14  }
  0x42   : > { %p732_p6 = por %p853_p4, %p34_p9  ;;  %s351_s9 = sshll.u32 %s154_s8, 3 }
  0x43   : > { %s352_s10 = sshll.u32 %s587_s15, 7  ;;  %s158_s27 = scalar_lea.vmem [#allocation2], %s351_s9 }
  0x44   : > { %s742_s24 = scalar_lea.hbm %s842_s0, %s352_s10  ;;  %s165_s21 = sshll.u32 %s158_s27, 4  ;;  %s744_s21 = int_to_ptr.vmem [resolvable:$true] %s165_s21 }
  0x45   : > { %p746_p11 = pnand %p391_p8, %p36_p1  ;;  %s155_s28 = scalar_lea.sflag [#allocation3], %s154_s8 }
  0x46   : > { %s487_s29 = scalar_lea.hbm %s742_s24, 128  ;;  %s492_s4 = scalar_lea.hbm %s842_s0, 256 }
  0x47   : > { %p488_p12 = scmp.ne.s32.totalorder %s742_s24, %s487_s29  ;;  %p489_p0 = pneg %p746_p11 }
  0x48   : > { %p493_p7 = scmp.lt.u32.totalorder %s742_s24, %s842_s0  ;;  %p494_p10 = scmp.lt.u32.totalorder %s492_s4, %s487_s29 }
  0x49   : > { %p490_p3 = pnand %p489_p0, %p488_p12  ;;  %p496_p9 = scmp.lt.u32.totalorder %s487_s29, %s742_s24 }
  0x4a   : > { %p495_p13 = por %p494_p10, %p493_p7 }
  0x4b   : > { %p491_p5 = pneg %p490_p3 }
  0x4c   : > { %p497_p2 = por %p496_p9, %p495_p13 }
  0x4e   : > { %p498_p1 = pnand %p497_p2, %p491_p5 }
  0x50   : > { %501 = shalt.err (!%p498_p1)
}
  0x51   : > { %s502_s8 = scalar_lea.vmem %s744_s21, 128  ;;  %s591_s9 = smov [#allocation2]  }
  0x52   : > { %p503_p4 = scmp.ne.s32.totalorder %s744_s21, %s502_s8  ;;  %s507_s10 = sshll.u32 %s591_s9, 4  ;;  %s508_s10 = int_to_ptr.vmem [resolvable:$false] %s507_s10 }
  0x53   : > { %s509_s11 = scalar_lea.vmem %s508_s10, 256  ;;  %p510_p3 = scmp.lt.s32.totalorder %s744_s21, %s508_s10 }
  0x54   : > { %p505_p8 = pnand %p503_p4, %p489_p0  ;;  %p511_p7 = scmp.lt.s32.totalorder %s509_s11, %s502_s8 }
  0x56   : > { %p506_p12 = pneg %p505_p8  ;;  %p512_p10 = por %p511_p7, %p510_p3 }
  0x58   : > { %p513_p13 = pnand %p512_p10, %p506_p12 }
  0x5a   : > { %516 = shalt.err (!%p513_p13)
}
  0x5b   : > { %384 = dma.hbm_to_vmem [thread:$0]  (!%p746_p11), %s742_s24, 128, %s744_s21, %s155_s28  }
  0x5c   : > { %p856_p5 = scmp.ne.s32.totalorder %s851_s20, 0 }
  0x5d   : > { %s778_s17 = sand.u32 (!%p856_p5), 1, %s579_s13   ;;  %p857_p0 = scmp.ne.s32.totalorder (!%p856_p5), %s849_s18, 0 }
  0x5e   : > { %174 = sbr.rel (%p856_p5) target bundleno = 303 (0x12f), region = 32  ;;  %s354_s27 = sshll.u32 (!%p856_p5), %s778_s17, 3 }
  0x5f   : > { %s177_s29 = scalar_lea.sflag (!%p856_p5), [#allocation3], %s778_s17  ;;  %s180_s30 = scalar_lea.vmem (!%p856_p5), [#allocation2], %s354_s27 }
  0x65   : > { %562 = dma.done.wait (%p857_p0), %s177_s29, 128  }
  0x66   : > { %564 = vsyncadd (%p857_p0), %s177_s29, 4294967168  ;;  %p858_p11 = scmp.eq.s32.totalorder %s634_s16, 0 }
  0x68   : > { %566 = dma.done.wait (%p858_p11), [#allocation6], 256   ;;  %p859_p9 = pmov %p858_p11 }
  0x69   : > { %v211_v0 = vld [vmem:[%s180_s30] sm:$0xff]  ;;  %v236_v24 = vld [vmem:[#allocation5] sm:$0xff]  ;;  %v237_v26 = vld [vmem:[#allocation7] sm:$0xff]  ;;  %s359_s18 = sshll.u32 %s634_s16, 7  ;;  %s210_s20 = scalar_lea.vmem [#allocation8], %s354_s27 }
  0x6a   : > { %568 = vsyncadd (%p859_p9), [#allocation6], 4294967040  ;;  %212 = vadd.xlane.f32.xlu0 %v211_v0  ;;  %v220_v1 = vmul.f32 %v211_v0, %v211_v0  ;;  %s257_s24 = sshll.u32 %s210_s20, 4  ;;  %s798_s28 = scalar_lea.hbm %s845_s3, %s359_s18  ;;  %s800_s24 = int_to_ptr.vmem [resolvable:$true] %s257_s24 }
  0x6b   : > { %s244_s22 = scalar_lea.sflag [#allocation4], %s778_s17  ;;  %s517_s4 = scalar_lea.vmem %s800_s24, 128 }
  0x6c   : > { %p518_p2 = scmp.ne.s32.totalorder %s800_s24, %s517_s4  ;;  %s592_s16 = smov [#allocation8]  }
  0x6d   : > { %s521_s5 = sshll.u32 %s592_s16, 4  ;;  %s522_s5 = int_to_ptr.vmem [resolvable:$false] %s521_s5 }
  0x6e   : > { %221 = vadd.xlane.f32.xlu0 %v220_v1  ;;  %p519_p1 = pnand %p518_p2, %p732_p6  ;;  %s523_s6 = scalar_lea.vmem %s522_s5, 256 }
  0x6f   : > { %p524_p8 = scmp.lt.s32.totalorder %s800_s24, %s522_s5  ;;  %p525_p12 = scmp.lt.s32.totalorder %s523_s6, %s517_s4 }
  0x70   : > { %p520_p4 = pneg %p519_p1 }
  0x71   : > { %p526_p3 = por %p525_p12, %p524_p8 }
  0x73   : > { %p527_p7 = pnand %p526_p3, %p520_p4 }
  0xf7   : > { %v213_v2 = vpop.xlane.xlu0 %212 }
  0xf8   : > { %v214_v3 = vrot.slane %v213_v2, 4 }
  0xfa   : > { %v215_v4 = vadd.f32 %v214_v3, %v213_v2 }
  0xfb   : > { %v222_v5 = vpop.xlane.xlu0 %221 }
  0xfc   : > { %v216_v6 = vrot.slane %v215_v4, 2  ;;  %v223_v7 = vrot.slane %v222_v5, 4 }
  0xfe   : > { %v217_v8 = vadd.f32 %v216_v6, %v215_v4  ;;  %v224_v9 = vadd.f32 %v223_v7, %v222_v5 }
 0x100   : > { %v218_v10 = vrot.slane %v217_v8, 1  ;;  %v225_v11 = vrot.slane %v224_v9, 2 }
 0x102   : > { %v219_v12 = vadd.f32 %v218_v10, %v217_v8  ;;  %v226_v13 = vadd.f32 %v225_v11, %v224_v9 }
 0x104   : > { %v229_v14 = vmul.f32 0.0009765625, %v219_v12  ;;  %v227_v15 = vrot.slane %v226_v13, 1 }
 0x106   : > { %v228_v16 = vadd.f32 %v227_v15, %v226_v13  ;;  %v231_v17 = vmul.f32 %v229_v14, %v229_v14  ;;  %v238_v22 = vsub.f32 %v211_v0, %v229_v14 }
 0x108   : > { %v230_v18 = vmul.f32 0.0009765625, %v228_v16 }
 0x10a   : > { %v232_v19 = vsub.f32 %v230_v18, %v231_v17 }
 0x10c   : > { %v233_v20 = vmax.f32 %v232_v19, 0.0 }
 0x10e   : > { %v234_v21 = vadd.f32 1e-05, %v233_v20 }
 0x110   : > { %429 = vrsqrt.f32 %v234_v21 }
 0x11a   : > { %v430_v23 = vpop.eup %429 }
 0x11b   : > { %v239_v25 = vmul.f32 %v430_v23, %v238_v22 }
 0x11d   : > { %v240_v27 = vmul.f32 %v239_v25, %v236_v24 }
 0x11f   : > { %v241_v28 = vadd.f32 %v240_v27, %v237_v26 }
 0x121   : > { %242 = vst [vmem:[%s210_s20] sm:$0xff] %v241_v28 }
 0x122   : > { %530 = shalt.err (!%p527_p7)
}
 0x123   : > { %s531_s8 = scalar_lea.hbm %s798_s28, 128  ;;  %s535_s11 = scalar_lea.hbm %s845_s3, 256 }
 0x124   : > { %p532_p10 = scmp.ne.s32.totalorder %s798_s28, %s531_s8  ;;  %p536_p0 = scmp.lt.u32.totalorder %s798_s28, %s845_s3 }
 0x125   : > { %p537_p11 = scmp.lt.u32.totalorder %s535_s11, %s531_s8  ;;  %p539_p2 = scmp.lt.u32.totalorder %s531_s8, %s798_s28 }
 0x126   : > { %p533_p13 = pnand %p532_p10, %p732_p6 }
 0x127   : > { %p538_p9 = por %p537_p11, %p536_p0 }
 0x128   : > { %p534_p5 = pneg %p533_p13 }
 0x129   : > { %p540_p1 = por %p539_p2, %p538_p9 }
 0x12b   : > { %p541_p4 = pnand %p540_p1, %p534_p5 }
 0x12d   : > { %544 = shalt.err (!%p541_p4)
}
 0x12e   : > { %372 = dma.vmem_to_hbm [thread:$0]  (%p732_p6), %s800_s24, 128, %s798_s28, %s244_s22  }
 0x12f PF: > { %s269_s29 = sand.u32 1, %s575_s12   ;;  %p860_p8 = scmp.ne.s32.totalorder %s850_s19, 0 }
 0x130   : > { %p861_p12 = scmp.ge.s32.totalorder %s587_s15, 2  ;;  %s270_s30 = scalar_lea.sflag [#allocation4], %s269_s29 }
 0x132   : > { %p386_p3 = pnand %p861_p12, %p860_p8 }
 0x134   : > { %570 = dma.done.wait (!%p386_p3), %s270_s30, 128  }
 0x135   : > { %572 = vsyncadd (!%p386_p3), %s270_s30, 4294967168  ;;  %p17_p7 = scmp.ge.s32.totalorder %s669_s26, 4   ;;  %s862_s12 = smov %s579_s13 }
 0x136   : > { %s863_s13 = smov %s583_s14  ;;  %s864_s14 = smov %s728_s25 }
 0x137   : > { %s865_s15 = smov %s669_s26  ;;  %19 = sbr.rel (!%p17_p7) target bundleno = 6 (0x6), region = 85 }
 0x13e   :  { %275 = vsyncpa [#allocation3], 1 }
 0x13f   :  { %277 = vsyncpa [#allocation3 + $0x1], 1 }
 0x140   :  { %278 = vsyncpa [#allocation6], 1 }
 0x141   :  { %279 = vsyncpa [#allocation4], 1 }
 0x142   :  { %281 = vsyncpa [#allocation4 + $0x1], 1 }

</bundles_post_ra>
